<compile_context>
chip_gen: v7x
topology: tpu7x:2x2x1
jax: 0.10.0
libtpu: 0.0.40
codegen_flags: <defaults>
</compile_context>

<pallas_src>
import jax
import jax.numpy as jnp
from jax.experimental import pallas as pl
from jax.experimental.pallas import tpu as pltpu

_BF16 = jnp.bfloat16


def _round_up(x, m):
    return (x + m - 1) // m * m


# ------------------------------- kernels -----------------------------------


def _pref_diff_kernel(h1_ref, h2_ref, c_ref, out_ref):
    """normalize=False: bias cancels, (h1-h2) @ (W^T @ U^T) fused to one MXU pass."""
    diff = h1_ref[...] - h2_ref[...]                                    # bf16 [TB, H]
    out_ref[...] = jnp.dot(
        diff, c_ref[...], preferred_element_type=jnp.float32
    ).astype(out_ref.dtype)                                             # [TB, Up]


def _pref_norm_kernel(h1_ref, h2_ref, wt_ref, b_ref, ut_ref, out_ref):
    """normalize=True: need both projections + bias before L2-normalization."""
    wt = wt_ref[...]                                                    # bf16 [H, Fp]
    b = b_ref[...].astype(jnp.float32)                                  # f32 [1, Fp]
    p1 = jnp.dot(h1_ref[...], wt, preferred_element_type=jnp.float32) + b
    p2 = jnp.dot(h2_ref[...], wt, preferred_element_type=jnp.float32) + b
    # Zero-padded F columns contribute 0 to the norms; eps guards ragged rows.
    eps = jnp.float32(1e-30)
    inv1 = jax.lax.rsqrt(jnp.maximum(jnp.sum(p1 * p1, -1, keepdims=True), eps))
    inv2 = jax.lax.rsqrt(jnp.maximum(jnp.sum(p2 * p2, -1, keepdims=True), eps))
    diff = (p1 * inv1 - p2 * inv2).astype(_BF16)                        # bf16 [TB, Fp]
    out_ref[...] = jnp.dot(
        diff, ut_ref[...], preferred_element_type=jnp.float32
    ).astype(out_ref.dtype)


# ----------------------------- tile selection --------------------------------


def _pick_tile_b(B, per_row_bytes, resident_bytes, vmem_budget=48 * 1024 * 1024):
    """Pick a batch tile: big enough to amortize grid-step overhead, small enough
    for v7x's 64 MiB VMEM, and giving >=2 grid steps for megacore when B allows."""
    if B <= 16:
        return B                                   # single full-array block
    cap = (vmem_budget - resident_bytes) // max(per_row_bytes, 1)
    cap = max(16, (cap // 16) * 16)
    cap = min(cap, 512)
    two_step = _round_up(pl.cdiv(B, 2), 16)        # keep both v7x TCs busy
    return int(max(16, min(cap, two_step)))


# ------------------------------- wrapper ------------------------------------


def make_pref_forward(w, b, users, *, normalize=False, bias=False):
    """One-time weight prep; returns forward(hidden1, hidden2) -> [B, U].

    w     : [F, H]  linear_head.weight (bf16)
    b     : [F]     linear_head.bias   (bf16)
    users : [U, F] (or [U, F-1] if bias=True)  (bf16)
    """
    F, H = w.shape
    if bias:
        ones = jnp.ones((users.shape[0], 1), dtype=users.dtype)
        users = jnp.concatenate([ones, users], axis=1)                  # [U, F]
    U = users.shape[0]
    Fp = _round_up(F, 128)
    Up = _round_up(max(U, 1), 128)

    if normalize:
        wt = jnp.pad(w.astype(_BF16).T, ((0, 0), (0, Fp - F)))          # [H, Fp]
        ut = jnp.pad(users.astype(_BF16).T, ((0, Fp - F), (0, Up - U))) # [Fp, Up]
        b2 = jnp.pad(b.astype(_BF16).reshape(1, F), ((0, 0), (0, Fp - F)))
        consts = (wt, b2, ut)
        kernel = _pref_norm_kernel
        resident_bytes = 2 * 2 * (wt.size + ut.size + b2.size)          # dbl-buffered bf16
    else:
        # Fused head: (h1-h2) @ W^T @ users_ext^T == (h1-h2) @ C, bias cancels.
        c = w.astype(jnp.float32).T @ users.astype(jnp.float32).T       # [H, U]
        c = jnp.pad(c, ((0, 0), (0, Up - U))).astype(_BF16)             # [H, Up]
        consts = (c,)
        kernel = _pref_diff_kernel
        resident_bytes = 2 * 2 * c.size

    def forward(hidden1, hidden2):
        B, Hh = hidden1.shape
        assert Hh == H and hidden2.shape == (B, H)
        if hidden1.dtype != _BF16:
            hidden1 = hidden1.astype(_BF16)
        if hidden2.dtype != _BF16:
            hidden2 = hidden2.astype(_BF16)

        # Per-row VMEM: h1+h2 double-buffered bf16 + output + f32 intermediates.
        per_row = 2 * 2 * H * 2 + 2 * Up * 2 + (4 * Fp * 4 if normalize else 0)
        tile_b = _pick_tile_b(B, per_row, resident_bytes)
        grid = (pl.cdiv(B, tile_b),)

        h_spec = pl.BlockSpec((tile_b, H), lambda i: (i, 0))
        out_spec = pl.BlockSpec((tile_b, Up), lambda i: (i, 0))
        if normalize:
            const_specs = [
                pl.BlockSpec((H, Fp), lambda i: (0, 0)),
                pl.BlockSpec((1, Fp), lambda i: (0, 0)),
                pl.BlockSpec((Fp, Up), lambda i: (0, 0)),
            ]
        else:
            const_specs = [pl.BlockSpec((H, Up), lambda i: (0, 0))]

        need = resident_bytes + tile_b * per_row + (4 << 20)
        vmem_limit = int(min(max(need, 32 << 20), 56 << 20))

        out_p = pl.pallas_call(
            kernel,
            out_shape=jax.ShapeDtypeStruct((B, Up), _BF16),
            grid=grid,
            in_specs=[h_spec, h_spec] + const_specs,
            out_specs=out_spec,
            compiler_params=pltpu.CompilerParams(
                dimension_semantics=("parallel",),
                vmem_limit_bytes=vmem_limit),
        )(hidden1, hidden2, *consts)
        return out_p[:, :U]

    return forward


def pref_forward(hidden1, hidden2, w, b, users, *, normalize=False, bias=False):
    """Convenience one-shot wrapper (weight prep not hoisted)."""
    return make_pref_forward(w, b, users, normalize=normalize, bias=bias)(
        hidden1, hidden2)


# ------------------------------ reference -----------------------------------


def _reference(hidden1, hidden2, w, b, users, *, normalize=False, bias=False):
    h1 = hidden1.astype(jnp.float32)
    h2 = hidden2.astype(jnp.float32)
    wf = w.astype(jnp.float32)
    bf = b.astype(jnp.float32)
    p1 = h1 @ wf.T + bf
    p2 = h2 @ wf.T + bf
    if normalize:
        p1 = p1 / jnp.linalg.norm(p1, axis=-1, keepdims=True)
        p2 = p2 / jnp.linalg.norm(p2, axis=-1, keepdims=True)
    if bias:
        u = jnp.concatenate(
            [jnp.ones((users.shape[0], 1), users.dtype), users], axis=1)
    else:
        u = users
    return ((p1 - p2) @ u.astype(jnp.float32).T).astype(_BF16)


if __name__ == "__main__":
    # Small shapes consistent with the module's forward:
    #   B=4 prompt pairs, hidden H=32 (stand-in for config.hidden_size),
    #   feature_dim F=16, n_users U=8.
    B, H, F, U = 4, 32, 16, 8

    key = jax.random.PRNGKey(0)
    k_h1, k_h2, k_w, k_b, k_u = jax.random.split(key, 5)

    hidden1 = jax.random.normal(k_h1, (B, H), dtype=jnp.float32).astype(_BF16)
    hidden2 = jax.random.normal(k_h2, (B, H), dtype=jnp.float32).astype(_BF16)
    # linear_head: torch.nn.Linear(hidden_size, feature_dim) -> weight [F,H], bias [F]
    w = (jax.random.normal(k_w, (F, H), dtype=jnp.float32)
         * (1.0 / jnp.sqrt(H))).astype(_BF16)
    b_param = (jax.random.normal(k_b, (F,), dtype=jnp.float32) * 0.01).astype(_BF16)

    ok = True
    for normalize in (False, True):
        for bias in (False, True):
            users = jax.random.normal(
                k_u, (U, F - 1 if bias else F), dtype=jnp.float32).astype(_BF16)

            fwd = make_pref_forward(w, b_param, users,
                                    normalize=normalize, bias=bias)
            out = jax.block_until_ready(fwd(hidden1, hidden2))

            ref = _reference(hidden1, hidden2, w, b_param, users,
                             normalize=normalize, bias=bias)
            assert out.shape == (B, U) and out.dtype == _BF16
            ok = ok and bool(jnp.allclose(out.astype(jnp.float32),
                                          ref.astype(jnp.float32),
                                          atol=1e-1, rtol=1e-1))

    assert ok
    print("KERNEL_OK")
</pallas_src>

<mosaic_0001>
module attributes {stable_mosaic.version = 11 : i64} {
  func.func @_pref_diff_kernel(%arg0: i32, %arg1: memref<4x32xbf16, #tpu.memory_space<vmem>>, %arg2: memref<4x32xbf16, #tpu.memory_space<vmem>>, %arg3: memref<32x128xbf16, #tpu.memory_space<vmem>>, %arg4: memref<4x128xbf16, #tpu.memory_space<vmem>>) attributes {dimension_semantics = [#tpu.dimension_semantics<parallel>], iteration_bounds = array<i64: 1>, scalar_prefetch = 0 : i64, scratch_operands = 0 : i64, tpu.core_type = #tpu.core_type<tc>, window_params = [{transform_indices = @transform_0, window_bounds = array<i64: 4, 32>}, {transform_indices = @transform_1, window_bounds = array<i64: 4, 32>}, {pipeline_mode = #tpu.pipeline_mode<synchronous>, transform_indices = @transform_2, window_bounds = array<i64: 32, 128>}, {transform_indices = @transform_3, window_bounds = array<i64: 4, 128>}]} {
    %c0 = arith.constant 0 : index
    %c0_0 = arith.constant 0 : index
    %0 = vector.load %arg1[%c0, %c0_0] : memref<4x32xbf16, #tpu.memory_space<vmem>>, vector<4x32xbf16>
    %c0_1 = arith.constant 0 : index
    %c0_2 = arith.constant 0 : index
    %1 = vector.load %arg2[%c0_1, %c0_2] : memref<4x32xbf16, #tpu.memory_space<vmem>>, vector<4x32xbf16>
    %2 = arith.subf %0, %1 : vector<4x32xbf16>
    %c0_3 = arith.constant 0 : index
    %c0_4 = arith.constant 0 : index
    %3 = vector.load %arg3[%c0_3, %c0_4] : memref<32x128xbf16, #tpu.memory_space<vmem>>, vector<32x128xbf16>
    %cst = arith.constant dense<0.000000e+00> : vector<4x128xf32>
    %4 = tpu.matmul %2, %3, %cst {dimension_numbers = #tpu.dot_dimension_numbers<[1], [0], [0], [1], [0, 0, 1, 1], [], []>} : vector<4x32xbf16>, vector<32x128xbf16>, vector<4x128xf32> -> vector<4x128xf32>
    %5 = arith.truncf %4 : vector<4x128xf32> to vector<4x128xbf16>
    %c0_5 = arith.constant 0 : index
    %c0_6 = arith.constant 0 : index
    %6 = vector.load %arg4[%c0_5, %c0_6] : memref<4x128xbf16, #tpu.memory_space<vmem>>, vector<4x128xbf16>
    tpu.vector_store %arg4[%c0_5, %c0_6], %5 {strides = array<i32>} : memref<4x128xbf16, #tpu.memory_space<vmem>>, vector<4x128xbf16>,
    return
  }
  func.func @transform_0(%arg0: i32) -> (i32, i32) {
    %c0_i32 = arith.constant 0 : i32
    %c0_i32_0 = arith.constant 0 : i32
    return %arg0, %c0_i32 : i32, i32
  }
  func.func @transform_1(%arg0: i32) -> (i32, i32) {
    %c0_i32 = arith.constant 0 : i32
    %c0_i32_0 = arith.constant 0 : i32
    return %arg0, %c0_i32 : i32, i32
  }
  func.func @transform_2(%arg0: i32) -> (i32, i32) {
    %c0_i32 = arith.constant 0 : i32
    %c0_i32_0 = arith.constant 0 : i32
    %c0_i32_1 = arith.constant 0 : i32
    return %c0_i32, %c0_i32_0 : i32, i32
  }
  func.func @transform_3(%arg0: i32) -> (i32, i32) {
    %c0_i32 = arith.constant 0 : i32
    %c0_i32_0 = arith.constant 0 : i32
    return %arg0, %c0_i32 : i32, i32
  }
}

</mosaic_0001>

<bundles_post_ra>
// kernel: tpu_custom_call.1
= control target key start
LH: loop header
LB: loop body
LE: loop exit
PB: predicated region body
PF: predicated region fallthrough
CT: control target
= control target key end

     0   :  { %8 = vsyncpa [#allocation3], 0  ;;  %s291_s0 = inlined_call_operand.hbm [shape: bf16[4,32], index: 0, kind: input, shape index: {}]   ;;  %s292_s1 = inlined_call_operand.vmem [shape: bf16[4,32], index: 1, kind: input, shape index: {}]   ;;  %s293_s2 = inlined_call_operand.hbm [shape: bf16[32,128], index: 2, kind: input, shape index: {}]   ;;  %s294_s3 = inlined_call_operand.hbm [shape: bf16[4,128], index: 3, kind: output, shape index: {}]  }
   0x1   :  { %9 = vsyncpa [#allocation6], 0 }
   0x2   :  { %10 = vsyncpa [#allocation4], 0  ;;  %s218_s12 = smov [#allocation2]   ;;  %s219_s14 = smov [#allocation5]  }
   0x3   :  { %s17_s13 = sshll.u32 %s218_s12, 4  ;;  %s28_s15 = sshll.u32 %s219_s14, 4  ;;  %s18_s13 = int_to_ptr.vmem [resolvable:$true] %s17_s13  ;;  %s245_s15 = int_to_ptr.vmem [resolvable:$true] %s28_s15 }
   0x4   :  { %s146_s18 = scalar_lea.hbm %s291_s0, 32 }
   0x5   :  { %p147_p0 = scmp.ne.s32.totalorder %s291_s0, %s146_s18  ;;  %p150_p1 = scmp.lt.u32.totalorder %s146_s18, %s291_s0 }
   0x7   :  { %p152_p2 = pnand %p150_p1, %p147_p0 }
   0x9   :  { %155 = shalt.err (!%p152_p2)
}
   0xa   :  { %s156_s23 = scalar_lea.vmem %s18_s13, 32  ;;  %p161_p4 = scmp.lt.s32.totalorder %s18_s13, %s18_s13 }
   0xb   :  { %p157_p3 = scmp.ne.s32.totalorder %s18_s13, %s156_s23  ;;  %p162_p5 = scmp.lt.s32.totalorder %s156_s23, %s156_s23 }
   0xd   :  { %p163_p6 = por %p162_p5, %p161_p4 }
   0xf   :  { %p164_p7 = pnand %p163_p6, %p157_p3 }
  0x11   :  { %167 = shalt.err (!%p164_p7)
}
  0x12   :  { %20 = dma.hbm_to_vmem [thread:$0]  %s291_s0, 32, %s18_s13, [#allocation3]  }
  0x13   :  { %s168_s28 = scalar_lea.hbm %s293_s2, 256 }
  0x14   :  { %p169_p8 = scmp.ne.s32.totalorder %s293_s2, %s168_s28  ;;  %p172_p9 = scmp.lt.u32.totalorder %s168_s28, %s293_s2 }
  0x16   :  { %p174_p10 = pnand %p172_p9, %p169_p8 }
  0x18   :  { %177 = shalt.err (!%p174_p10)
}
  0x19   :  { %s178_s6 = scalar_lea.vmem %s245_s15, 256  ;;  %p183_p12 = scmp.lt.s32.totalorder %s245_s15, %s245_s15 }
  0x1a   :  { %p179_p11 = scmp.ne.s32.totalorder %s245_s15, %s178_s6  ;;  %p184_p13 = scmp.lt.s32.totalorder %s178_s6, %s178_s6 }
  0x1c   :  { %p185_p0 = por %p184_p13, %p183_p12 }
  0x1e   :  { %p186_p1 = pnand %p185_p0, %p179_p11 }
  0x20   :  { %189 = shalt.err (!%p186_p1)
}
  0x21   :  { %s220_s0 = smov 64   ;;  %s221_s7 = smov 4  }
  0x22   :  { %34 = dma.hbm_to_vmem [thread:$0]  %s293_s2, 256, %s245_s15, [#allocation6], %s220_s0, %s220_s0, %s221_s7  }
  0x23   :  { %212 = dma.done.wait [#allocation3], 32  }
  0x24   :  { %213 = vsyncadd [#allocation3], 4294967264 }
  0x25   :  { %214 = dma.done.wait [#allocation6], 256  }
  0x26   :  { %215 = vsyncadd [#allocation6], 4294967040  ;;  %v222_v0 = vmov 0.0   ;;  %vm223_vm0 = vmmov 0   ;;  %v144_v1 = vld [vmem:[#allocation5] sm:$0xff]   ;;  %v145_v2 = vld [vmem:[#allocation5 + $0x8] sm:$0xff]  }
  0x27   :  { %129 = vmatprep.subr.bf16.mxu0 %v222_v0  ;;  %133 = vmatprep.mubr.msk.bf16.mxu0 %vm223_vm0, %v222_v0  ;;  %v42_v3 = vld [vmem:[#allocation2] sm:$0x3]  ;;  %vm61_vm1 = vcmask 261120   ;;  %s224_s2 = smov [#allocation7]  }
  0x28   :  { %130 = vmatpush3.bf16.msra.mxu0 %v144_v1  ;;  %v43_v4 = vld [vmem:[%s292_s1] sm:$0x3]  ;;  %s113_s12 = sshll.u32 %s224_s2, 4  ;;  %s114_s12 = int_to_ptr.vmem [resolvable:$true] %s113_s12 }
  0x29   :  { %131 = vmatprep.subr.bf16.mxu0 %v222_v0  ;;  %v44_v5 = vsub.bf16 %v42_v3, %v43_v4  ;;  %s190_s13 = scalar_lea.vmem %s114_s12, 32  ;;  %p195_p3 = scmp.lt.s32.totalorder %s114_s12, %s114_s12 }
  0x2a   :  { %p191_p2 = scmp.ne.s32.totalorder %s114_s12, %s190_s13  ;;  %p196_p4 = scmp.lt.s32.totalorder %s190_s13, %s190_s13 }
  0x2c   :  { %132 = vmatpush3.bf16.msra.mxu0 %v145_v2  ;;  %p197_p5 = por %p196_p4, %p195_p3 }
  0x2e   :  { %p198_p6 = pnand %p197_p5, %p191_p2 }
  0x2f   :  { %134 = vmatmul.mubr.msk.bf16.vlgmr.msra.gmra.mrb[0].mxu0 %vm61_vm1, %v44_v5 }
 0x102   :  { %v99_v6 = vpop.f32.mrb[0].mxu0 }
 0x103   :  { %v105_v7 = vpack.c.bf16 %v99_v6, %v99_v6  ;;  %v135_v8 = vpop.f32.mrb[1].mxu0 }
 0x104   :  { %v102_v9 = vpop.f32.mrb[2].mxu0 }
 0x105   :  { %106 = vst [vmem:[#allocation7] sm:$0x3] %v105_v7  ;;  %v136_v10 = vpop.f32.mrb[3].mxu0 }
 0x106   :  { %201 = shalt.err (!%p198_p6)
}
 0x107   :  { %s202_s15 = scalar_lea.hbm %s294_s3, 32 }
 0x108   :  { %p203_p7 = scmp.ne.s32.totalorder %s294_s3, %s202_s15  ;;  %p206_p8 = scmp.lt.u32.totalorder %s202_s15, %s294_s3 }
 0x10a   :  { %p208_p9 = pnand %p206_p8, %p203_p7 }
 0x10c   :  { %211 = shalt.err (!%p208_p9)
}
 0x10d   :  { %116 = dma.vmem_to_hbm [thread:$0]  %s114_s12, 32, %s294_s3, [#allocation4]  }
 0x10e   :  { %216 = dma.done.wait [#allocation4], 32  }
 0x10f   :  { %217 = vsyncadd [#allocation4], 4294967264 }
 0x110   :  { %120 = vsyncpa [#allocation3], 1 }
 0x111   :  { %121 = vsyncpa [#allocation6], 1 }
 0x112   :  { %122 = vsyncpa [#allocation4], 1 }

</bundles_post_ra>
